<compile_context>
chip_gen: v7x
topology: tpu7x:2x2x1
jax: 0.10.0
libtpu: 0.0.40
codegen_flags: <defaults>
</compile_context>

<pallas_src>
import functools

import jax
import jax.numpy as jnp
from jax import lax
from jax.experimental import pallas as pl
from jax.experimental.pallas import tpu as pltpu

LANE = 128


def mlp_kernel(x_ref,
               w1_ref, b1_ref,
               w2_ref, b2_ref,
               w3_ref, b3_ref,
               w4_ref, b4_ref,
               o_ref,
               *, chunk, num_chunks, unroll):
    # Tiny weights/biases: VMEM-resident, load once per grid step (hoisted
    # out of the chunk loop).
    w1 = w1_ref[...]; b1 = b1_ref[...]
    w2 = w2_ref[...]; b2 = b2_ref[...]
    w3 = w3_ref[...]; b3 = b3_ref[...]
    w4 = w4_ref[...]; b4 = b4_ref[...]

    def sigmoid(h):
        # Exact identity: sigmoid(x) = 0.5 * tanh(0.5 * x) + 0.5
        # (single EUP transcendental, no full-precision divide).
        return 0.5 * jnp.tanh(0.5 * h) + 0.5

    def body(c, carry):
        start = pl.multiple_of(c * chunk, LANE)
        x = x_ref[:, pl.ds(start, chunk)]                               # [5, C]

        h = jnp.dot(w1, x, preferred_element_type=jnp.float32) + b1     # [20, C]
        h = sigmoid(h)
        h = jnp.dot(w2, h, preferred_element_type=jnp.float32) + b2     # [15, C]
        h = sigmoid(h)
        h = jnp.dot(w3, h, preferred_element_type=jnp.float32) + b3     # [10, C]
        h = jnp.maximum(h, 0.0)
        # Linear(10 -> 1): VPU multiply + sublane reduce (no N=1 MXU pass).
        out = jnp.sum(h * w4, axis=0, keepdims=True) + b4               # [1, C]

        o_ref[:, pl.ds(start, chunk)] = out.astype(o_ref.dtype)
        return carry

    lax.fori_loop(0, num_chunks, body, None, unroll=unroll)


def _round_up(n, m):
    return (n + m - 1) // m * m


@functools.partial(jax.jit, static_argnames=("tile_b",))
def mlp_forward(x, params, tile_b=32768):
    """x: [B, 5] float32. params: PyTorch-layout weights w[out, in], biases b[out]."""
    B = x.shape[0]

    # Batch tile (in lanes): multiple of 128, capped by tile_b and the rounded
    # batch; keep >= 2 grid steps when the batch allows it so the "parallel"
    # axis can be split across TensorCores (v7x megacore).
    B_r = _round_up(B, LANE)
    tb = min(_round_up(tile_b, LANE), B_r)
    if B_r >= 2 * LANE:
        tb = min(tb, _round_up(B_r // 2, LANE))
    grid = (pl.cdiv(B, tb),)

    # In-kernel strip-mining of the lane dim: per-chunk intermediates stay in
    # vregs instead of spilling [20/15/10, tb] temporaries to VMEM.
    chunk = 512
    while tb % chunk:
        chunk //= 2                      # tb is a multiple of 128, so this terminates
    num_chunks = tb // chunk
    if num_chunks <= 8:
        unroll = True                    # fully unroll short chunk loops
    else:
        unroll = next(u for u in (8, 4, 2, 1) if num_chunks % u == 0)

    # Feature-major layout: batch on lanes.  (If the producer can hand over
    # [5, B] directly, pass it in and drop this transpose -- it is the only
    # extra HBM pass left outside the kernel.)
    x_t = x.T                                                            # [5, B]

    w1, b1 = params["w1"], params["b1"]
    w2, b2 = params["w2"], params["b2"]
    w3, b3 = params["w3"], params["b3"]
    w4, b4 = params["w4"], params["b4"]

    b1c = b1.reshape(20, 1)
    b2c = b2.reshape(15, 1)
    b3c = b3.reshape(10, 1)
    b4c = b4.reshape(1, 1)
    w4c = w4.reshape(10, 1)          # column vector for the VPU reduce

    const = lambda i: (0, 0)         # weights/biases: DMA once, stay VMEM-resident
    kernel = functools.partial(mlp_kernel, chunk=chunk,
                               num_chunks=num_chunks, unroll=unroll)

    out_t = pl.pallas_call(
        kernel,
        out_shape=jax.ShapeDtypeStruct((1, B), jnp.float32),
        grid=grid,
        in_specs=[
            pl.BlockSpec((5, tb), lambda i: (0, i)),      # x tile (double-buffered)
            pl.BlockSpec((20, 5), const),  pl.BlockSpec((20, 1), const),
            pl.BlockSpec((15, 20), const), pl.BlockSpec((15, 1), const),
            pl.BlockSpec((10, 15), const), pl.BlockSpec((10, 1), const),
            pl.BlockSpec((10, 1), const),  pl.BlockSpec((1, 1), const),
        ],
        out_specs=pl.BlockSpec((1, tb), lambda i: (0, i)),
        compiler_params=pltpu.CompilerParams(
            dimension_semantics=("parallel",),   # shard batch tiles across TCs (v7x)
            vmem_limit_bytes=32 * 1024 * 1024,   # safe on 64 MiB (v7x) / 128 MiB VMEM
        ),
    )(x_t, w1, b1c, w2, b2c, w3, b3c, w4c, b4c)

    # lane-dense [1, B] -> [B, 1]  (row-major order is identical)
    return out_t.reshape(B, 1)


def init_params(key):
    """Deterministic init mirroring nn.Linear: w[out, in], b[out], U(+/-1/sqrt(fan_in))."""
    dims = [(5, 20), (20, 15), (15, 10), (10, 1)]
    params = {}
    for idx, (fan_in, fan_out) in enumerate(dims, start=1):
        key, kw, kb = jax.random.split(key, 3)
        bound = 1.0 / jnp.sqrt(float(fan_in))
        params[f"w{idx}"] = jax.random.uniform(
            kw, (fan_out, fan_in), jnp.float32, -bound, bound)
        params[f"b{idx}"] = jax.random.uniform(
            kb, (fan_out,), jnp.float32, -bound, bound)
    return params


def ref_forward(x, p):
    h = jax.nn.sigmoid(x @ p["w1"].T + p["b1"])
    h = jax.nn.sigmoid(h @ p["w2"].T + p["b2"])
    h = jnp.maximum(h @ p["w3"].T + p["b3"], 0.0)
    return h @ p["w4"].T + p["b4"]


if __name__ == "__main__":
    key = jax.random.PRNGKey(0)
    key, kx = jax.random.split(key)
    params = init_params(key)

    # Small batch (single tile, ragged/masked lane path).
    x_small = jax.random.normal(kx, (8, 5), jnp.float32)
    out_small = jax.block_until_ready(mlp_forward(x_small, params))
    assert out_small.shape == (8, 1)
    assert jnp.allclose(out_small, ref_forward(x_small, params), atol=1e-5, rtol=1e-5)

    # Multi-tile path with a small forced tile (exercises grid + ragged last tile).
    key, kx2 = jax.random.split(key)
    x_big = jax.random.normal(kx2, (300, 5), jnp.float32)
    out_big = jax.block_until_ready(mlp_forward(x_big, params, tile_b=128))
    assert out_big.shape == (300, 1)
    assert jnp.allclose(out_big, ref_forward(x_big, params), atol=1e-5, rtol=1e-5)

    # Default (large-tile, >=2-step) path on the same batch.
    out_big2 = jax.block_until_ready(mlp_forward(x_big, params))
    assert out_big2.shape == (300, 1)
    assert jnp.allclose(out_big2, ref_forward(x_big, params), atol=1e-5, rtol=1e-5)

    print("KERNEL_OK")
</pallas_src>

<mosaic_0001>
module attributes {stable_mosaic.version = 11 : i64} {
  func.func @mlp_kernel(%arg0: i32, %arg1: memref<5x128xf32, #tpu.memory_space<vmem>>, %arg2: memref<20x5xf32, #tpu.memory_space<vmem>>, %arg3: memref<20x1xf32, #tpu.memory_space<vmem>>, %arg4: memref<15x20xf32, #tpu.memory_space<vmem>>, %arg5: memref<15x1xf32, #tpu.memory_space<vmem>>, %arg6: memref<10x15xf32, #tpu.memory_space<vmem>>, %arg7: memref<10x1xf32, #tpu.memory_space<vmem>>, %arg8: memref<10x1xf32, #tpu.memory_space<vmem>>, %arg9: memref<1x1xf32, #tpu.memory_space<vmem>>, %arg10: memref<1x128xf32, #tpu.memory_space<vmem>>) attributes {dimension_semantics = [#tpu.dimension_semantics<parallel>], iteration_bounds = array<i64: 1>, scalar_prefetch = 0 : i64, scratch_operands = 0 : i64, tpu.core_type = #tpu.core_type<tc>, window_params = [{transform_indices = @transform_0, window_bounds = array<i64: 5, 128>}, {pipeline_mode = #tpu.pipeline_mode<synchronous>, transform_indices = @transform_1, window_bounds = array<i64: 20, 5>}, {pipeline_mode = #tpu.pipeline_mode<synchronous>, transform_indices = @transform_2, window_bounds = array<i64: 20, 1>}, {pipeline_mode = #tpu.pipeline_mode<synchronous>, transform_indices = @transform_3, window_bounds = array<i64: 15, 20>}, {pipeline_mode = #tpu.pipeline_mode<synchronous>, transform_indices = @transform_4, window_bounds = array<i64: 15, 1>}, {pipeline_mode = #tpu.pipeline_mode<synchronous>, transform_indices = @transform_5, window_bounds = array<i64: 10, 15>}, {pipeline_mode = #tpu.pipeline_mode<synchronous>, transform_indices = @transform_6, window_bounds = array<i64: 10, 1>}, {pipeline_mode = #tpu.pipeline_mode<synchronous>, transform_indices = @transform_7, window_bounds = array<i64: 10, 1>}, {pipeline_mode = #tpu.pipeline_mode<synchronous>, transform_indices = @transform_8, window_bounds = array<i64: 1, 1>}, {transform_indices = @transform_9, window_bounds = array<i64: 1, 128>}]} {
    %c0 = arith.constant 0 : index
    %c0_0 = arith.constant 0 : index
    %0 = vector.load %arg2[%c0, %c0_0] : memref<20x5xf32, #tpu.memory_space<vmem>>, vector<20x5xf32>
    %c0_1 = arith.constant 0 : index
    %c0_2 = arith.constant 0 : index
    %1 = vector.load %arg3[%c0_1, %c0_2] : memref<20x1xf32, #tpu.memory_space<vmem>>, vector<20x1xf32>
    %c0_3 = arith.constant 0 : index
    %c0_4 = arith.constant 0 : index
    %2 = vector.load %arg4[%c0_3, %c0_4] : memref<15x20xf32, #tpu.memory_space<vmem>>, vector<15x20xf32>
    %c0_5 = arith.constant 0 : index
    %c0_6 = arith.constant 0 : index
    %3 = vector.load %arg5[%c0_5, %c0_6] : memref<15x1xf32, #tpu.memory_space<vmem>>, vector<15x1xf32>
    %c0_7 = arith.constant 0 : index
    %c0_8 = arith.constant 0 : index
    %4 = vector.load %arg6[%c0_7, %c0_8] : memref<10x15xf32, #tpu.memory_space<vmem>>, vector<10x15xf32>
    %c0_9 = arith.constant 0 : index
    %c0_10 = arith.constant 0 : index
    %5 = vector.load %arg7[%c0_9, %c0_10] : memref<10x1xf32, #tpu.memory_space<vmem>>, vector<10x1xf32>
    %c0_11 = arith.constant 0 : index
    %c0_12 = arith.constant 0 : index
    %6 = vector.load %arg8[%c0_11, %c0_12] : memref<10x1xf32, #tpu.memory_space<vmem>>, vector<10x1xf32>
    %c0_13 = arith.constant 0 : index
    %c0_14 = arith.constant 0 : index
    %7 = vector.load %arg9[%c0_13, %c0_14] : memref<1x1xf32, #tpu.memory_space<vmem>>, vector<1x1xf32>
    %c0_i32 = arith.constant 0 : i32
    %c128_i32 = arith.constant 128 : i32
    %8 = arith.muli %c0_i32, %c128_i32 : i32
    %9 = tpu.assume_multiple %8, 128 : i32
    %c0_15 = arith.constant 0 : index
    %10 = arith.index_cast %9 : i32 to index
    %11 = vector.load %arg1[%c0_15, %10] : memref<5x128xf32, #tpu.memory_space<vmem>>, vector<5x128xf32>
    %cst = arith.constant dense<0.000000e+00> : vector<20x128xf32>
    %12 = tpu.matmul %0, %11, %cst {dimension_numbers = #tpu.dot_dimension_numbers<[1], [0], [0], [1], [0, 0, 1, 1], [], []>} : vector<20x5xf32>, vector<5x128xf32>, vector<20x128xf32> -> vector<20x128xf32>
    %13 = vector.broadcast %1 : vector<20x1xf32> to vector<20x128xf32>
    %14 = arith.addf %12, %13 : vector<20x128xf32>
    %cst_16 = arith.constant 5.000000e-01 : f32
    %15 = vector.broadcast %cst_16 : f32 to vector<20x128xf32>
    %16 = arith.mulf %15, %14 : vector<20x128xf32>
    %17 = math.tanh %16 : vector<20x128xf32>
    %cst_17 = arith.constant 5.000000e-01 : f32
    %18 = vector.broadcast %cst_17 : f32 to vector<20x128xf32>
    %19 = arith.mulf %18, %17 : vector<20x128xf32>
    %cst_18 = arith.constant 5.000000e-01 : f32
    %20 = vector.broadcast %cst_18 : f32 to vector<20x128xf32>
    %21 = arith.addf %19, %20 : vector<20x128xf32>
    %cst_19 = arith.constant dense<0.000000e+00> : vector<15x128xf32>
    %22 = tpu.matmul %2, %21, %cst_19 {dimension_numbers = #tpu.dot_dimension_numbers<[1], [0], [0], [1], [0, 0, 1, 1], [], []>} : vector<15x20xf32>, vector<20x128xf32>, vector<15x128xf32> -> vector<15x128xf32>
    %23 = vector.broadcast %3 : vector<15x1xf32> to vector<15x128xf32>
    %24 = arith.addf %22, %23 : vector<15x128xf32>
    %cst_20 = arith.constant 5.000000e-01 : f32
    %25 = vector.broadcast %cst_20 : f32 to vector<15x128xf32>
    %26 = arith.mulf %25, %24 : vector<15x128xf32>
    %27 = math.tanh %26 : vector<15x128xf32>
    %cst_21 = arith.constant 5.000000e-01 : f32
    %28 = vector.broadcast %cst_21 : f32 to vector<15x128xf32>
    %29 = arith.mulf %28, %27 : vector<15x128xf32>
    %cst_22 = arith.constant 5.000000e-01 : f32
    %30 = vector.broadcast %cst_22 : f32 to vector<15x128xf32>
    %31 = arith.addf %29, %30 : vector<15x128xf32>
    %cst_23 = arith.constant dense<0.000000e+00> : vector<10x128xf32>
    %32 = tpu.matmul %4, %31, %cst_23 {dimension_numbers = #tpu.dot_dimension_numbers<[1], [0], [0], [1], [0, 0, 1, 1], [], []>} : vector<10x15xf32>, vector<15x128xf32>, vector<10x128xf32> -> vector<10x128xf32>
    %33 = vector.broadcast %5 : vector<10x1xf32> to vector<10x128xf32>
    %34 = arith.addf %32, %33 : vector<10x128xf32>
    %cst_24 = arith.constant 0.000000e+00 : f32
    %35 = vector.broadcast %cst_24 : f32 to vector<10x128xf32>
    %36 = arith.maximumf %34, %35 : vector<10x128xf32>
    %37 = vector.broadcast %6 : vector<10x1xf32> to vector<10x128xf32>
    %38 = arith.mulf %36, %37 : vector<10x128xf32>
    %cst_25 = arith.constant dense<0.000000e+00> : vector<128xf32>
    %39 = vector.multi_reduction <add>, %38, %cst_25 [0] : vector<10x128xf32> to vector<128xf32>
    %40 = vector.shape_cast %39 : vector<128xf32> to vector<1x128xf32>
    %41 = vector.broadcast %7 : vector<1x1xf32> to vector<1x128xf32>
    %42 = arith.addf %40, %41 : vector<1x128xf32>
    %c0_26 = arith.constant 0 : index
    %43 = arith.index_cast %9 : i32 to index
    %44 = vector.load %arg10[%c0_26, %43] : memref<1x128xf32, #tpu.memory_space<vmem>>, vector<1x128xf32>
    tpu.vector_store %arg10[%c0_26, %43], %42 {strides = array<i32>} : memref<1x128xf32, #tpu.memory_space<vmem>>, vector<1x128xf32>,
    %c1_i32 = arith.constant 1 : i32
    return
  }
  func.func @transform_0(%arg0: i32) -> (i32, i32) {
    %c0_i32 = arith.constant 0 : i32
    %c0_i32_0 = arith.constant 0 : i32
    return %c0_i32, %arg0 : i32, i32
  }
  func.func @transform_1(%arg0: i32) -> (i32, i32) {
    %c0_i32 = arith.constant 0 : i32
    %c0_i32_0 = arith.constant 0 : i32
    %c0_i32_1 = arith.constant 0 : i32
    return %c0_i32, %c0_i32_0 : i32, i32
  }
  func.func @transform_2(%arg0: i32) -> (i32, i32) {
    %c0_i32 = arith.constant 0 : i32
    %c0_i32_0 = arith.constant 0 : i32
    %c0_i32_1 = arith.constant 0 : i32
    return %c0_i32, %c0_i32_0 : i32, i32
  }
  func.func @transform_3(%arg0: i32) -> (i32, i32) {
    %c0_i32 = arith.constant 0 : i32
    %c0_i32_0 = arith.constant 0 : i32
    %c0_i32_1 = arith.constant 0 : i32
    return %c0_i32, %c0_i32_0 : i32, i32
  }
  func.func @transform_4(%arg0: i32) -> (i32, i32) {
    %c0_i32 = arith.constant 0 : i32
    %c0_i32_0 = arith.constant 0 : i32
    %c0_i32_1 = arith.constant 0 : i32
    return %c0_i32, %c0_i32_0 : i32, i32
  }
  func.func @transform_5(%arg0: i32) -> (i32, i32) {
    %c0_i32 = arith.constant 0 : i32
    %c0_i32_0 = arith.constant 0 : i32
    %c0_i32_1 = arith.constant 0 : i32
    return %c0_i32, %c0_i32_0 : i32, i32
  }
  func.func @transform_6(%arg0: i32) -> (i32, i32) {
    %c0_i32 = arith.constant 0 : i32
    %c0_i32_0 = arith.constant 0 : i32
    %c0_i32_1 = arith.constant 0 : i32
    return %c0_i32, %c0_i32_0 : i32, i32
  }
  func.func @transform_7(%arg0: i32) -> (i32, i32) {
    %c0_i32 = arith.constant 0 : i32
    %c0_i32_0 = arith.constant 0 : i32
    %c0_i32_1 = arith.constant 0 : i32
    return %c0_i32, %c0_i32_0 : i32, i32
  }
  func.func @transform_8(%arg0: i32) -> (i32, i32) {
    %c0_i32 = arith.constant 0 : i32
    %c0_i32_0 = arith.constant 0 : i32
    %c0_i32_1 = arith.constant 0 : i32
    return %c0_i32, %c0_i32_0 : i32, i32
  }
  func.func @transform_9(%arg0: i32) -> (i32, i32) {
    %c0_i32 = arith.constant 0 : i32
    %c0_i32_0 = arith.constant 0 : i32
    return %c0_i32, %arg0 : i32, i32
  }
}

</mosaic_0001>

<bundles_post_ra>
// kernel: mlp_forward.1
= control target key start
LH: loop header
LB: loop body
LE: loop exit
PB: predicated region body
PF: predicated region fallthrough
CT: control target
= control target key end

     0   :  { %s654_s0 = inlined_call_operand.vmem [shape: f32[5,8], index: 0, kind: input, shape index: {}]   ;;  %s655_s1 = inlined_call_operand.vmem [shape: f32[20,5], index: 1, kind: input, shape index: {}]   ;;  %s656_s2 = inlined_call_operand.vmem [shape: f32[20,1], index: 2, kind: input, shape index: {}]   ;;  %s657_s3 = inlined_call_operand.vmem [shape: f32[15,20], index: 3, kind: input, shape index: {}]   ;;  %s658_s4 = inlined_call_operand.vmem [shape: f32[15,1], index: 4, kind: input, shape index: {}]   ;;  %s659_s5 = inlined_call_operand.vmem [shape: f32[10,15], index: 5, kind: input, shape index: {}]   ;;  %s660_s6 = inlined_call_operand.vmem [shape: f32[10,1], index: 6, kind: input, shape index: {}]   ;;  %s661_s7 = inlined_call_operand.vmem [shape: f32[10,1], index: 7, kind: input, shape index: {}]   ;;  %s662_s8 = inlined_call_operand.<no memory space> [shape: f32[1,1], index: 8, kind: input, shape index: {}]   ;;  %s663_s9 = inlined_call_operand.hbm [shape: f32[1,8], index: 9, kind: output, shape index: {}]  }
   0x1   :  { %v14_v0 = vstv %s662_s8 }
   0x2   :  { %15 = vst [vmem:[#allocation2] sm:$0x1] %v14_v0 }
   0x3   :  { %v52_v1 = vld [vmem:[%s654_s0] sm:$0x1f]  ;;  %vm78_vm0 = vcmask 1044480   ;;  %v523_v3 = vmov 0.0   ;;  %vm524_vm1 = vmmov 0   ;;  %vm68_vm2 = vcmask 39936  }
   0x4   :  { %v35_v2 = vld [vmem:[%s655_s1] sm:$0xff]  ;;  %445 = vmatprep.subr.mxu0 %v523_v3  ;;  %447 = vmatprep.mubr.msk.f32.mxu0 %vm524_vm1, %v523_v3  ;;  %v525_v5 = vmov 0   ;;  %v40_v6 = vld [vmem:[%s656_s2 + $0x10] sm:$0xf]  ;;  %v36_v7 = vld [vmem:[%s655_s1 + $0x8] sm:$0xff] }
   0x5   :  { %v38_v4 = vld [vmem:[%s656_s2] sm:$0xff]  ;;  %446 = vmatpush3.msk.msra.mxu0 %vm78_vm0, %v52_v1  ;;  %487 = vset.pattern.permute.xlu0 %v525_v5  ;;  %v39_v8 = vld [vmem:[%s656_s2 + $0x8] sm:$0xff] }
   0x6   :  { %448 = vmatmul.mubr.msk.f32.vlgmr.msra.gmra.mrb[0].mxu0 %vm68_vm2, %v35_v2  ;;  %55 = vperm.xlu0 %487, %v38_v4  }
   0x7   :  { %450 = vmatprep.mubr.msk.f32.mxu0 %vm524_vm1, %v523_v3  ;;  %488 = vset.pattern.permute.xlu1 %v525_v5 }
   0x8   :  { %65 = vperm.xlu1 %488, %v40_v6  }
   0x9   :  { %16 = vsyncpa [#allocation4], 0  ;;  %v43_v9 = vld [vmem:[%s658_s4] sm:$0xff]  ;;  %v37_v10 = vld [vmem:[%s655_s1 + $0x10] sm:$0xf]  ;;  %vm184_vm3 = vcmask 162816  }
   0xa   :  { %451 = vmatmul.mubr.msk.f32.gmra.mrb[2].mxu0 %vm68_vm2, %v36_v7  ;;  %60 = vperm.xlu0 %487, %v39_v8   ;;  %v44_v11 = vld [vmem:[%s658_s4 + $0x8] sm:$0x7f]  ;;  %v47_v13 = vld [vmem:[%s660_s6] sm:$0xff]  ;;  %vm191_vm4 = vcmask 1043456   ;;  %vm288_vm5 = vcmask 121856   ;;  %vm295_vm6 = vcmask 1046528  }
   0xb   :  { %453 = vmatprep.mubr.msk.f32.mxu0 %vm524_vm1, %v523_v3  ;;  %v48_v12 = vld [vmem:[%s660_s6 + $0x8] sm:$0x3]  ;;  %v49_v15 = vld [vmem:[%s661_s7] sm:$0xff]  ;;  %vm526_vm7 = vmmov 1   ;;  %vm388_vm9 = vcmask 1041408  }
   0xc   :  { %176 = vperm.xlu1 %488, %v43_v9   ;;  %v50_v14 = vld [vmem:[%s661_s7 + $0x8] sm:$0x3]  ;;  %v51_v16 = vld [vmem:[#allocation2] sm:$0x1]  ;;  %vm477_vm8 = vmpackc.low %vm295_vm6, %vm526_vm7 }
   0xd   :  { %v41_v17 = vld [vmem:[%s657_s3] sm:$0xff]  ;;  %v42_v43 = vld [vmem:[%s657_s3 + $0x8] sm:$0x7f] }
   0xe   :  { %454 = vmatmul.mubr.msk.f32.gmra.mrb[4].mxu0 %vm68_vm2, %v37_v10  ;;  %181 = vperm.xlu0 %487, %v44_v11   ;;  %v45_v44 = vld [vmem:[%s659_s5] sm:$0xff]  ;;  %v46_v60 = vld [vmem:[%s659_s5 + $0x8] sm:$0x3]  ;;  %v402_v10 = vlaneseq  ;;  %s527_s5 = smov [#allocation3]  }
   0xf   :  { %462 = vmatprep.mubr.msk.f32.mxu1 %vm184_vm3, %v41_v17  ;;  %s414_s16 = sshll.u32 %s527_s5, 4  ;;  %s415_s16 = int_to_ptr.vmem [resolvable:$true] %s414_s16 }
  0x10   :  { %285 = vperm.xlu1 %488, %v48_v12   ;;  %s499_s8 = scalar_lea.vmem %s415_s16, 16  ;;  %s503_s0 = scalar_lea.vmem %s415_s16, 32 }
  0x11   :  { %p500_p0 = scmp.ne.s32.totalorder %s415_s16, %s499_s8  ;;  %p504_p1 = scmp.lt.s32.totalorder %s415_s16, %s415_s16 }
  0x12   :  { %280 = vperm.xlu0 %487, %v47_v13   ;;  %v403_v13 = vshrl.u32 %v402_v10, 7  ;;  %p505_p2 = scmp.lt.s32.totalorder %s503_s0, %s499_s8 }
  0x14   :  { %383 = vperm.xlu1 %488, %v50_v14   ;;  %p506_p3 = por %p505_p2, %p504_p1 }
  0x16   :  { %378 = vperm.xlu0 %487, %v49_v15   ;;  %p507_p4 = pnand %p506_p3, %p500_p0 }
  0x18   :  { %399 = vperm.xlu1 %488, %v51_v16   ;;  %v404_v16 = vsub.s32 0, %v403_v13 }
  0x85   :  { %v56_v18 = vpop.permute.xlu0 %55 }
  0x87   :  { %v66_v28 = vpop.permute.xlu1 %65 }
  0x89   :  { %v61_v23 = vpop.permute.xlu0 %60 }
  0x8b   :  { %v177_v47 = vpop.permute.xlu1 %176 }
  0x8d   :  { %v182_v45 = vpop.permute.xlu0 %181 }
  0x8f   :  { %v286_v61 = vpop.permute.xlu1 %285 }
  0x91   :  { %v281_v62 = vpop.permute.xlu0 %280 }
  0x93   :  { %v384_v4 = vpop.permute.xlu1 %383 }
  0x95   :  { %v379_v6 = vpop.permute.xlu0 %378 }
  0xd9   :  { %v148_v19 = vpop.f32.mrb[0].mxu0 }
  0xda   :  { %v149_v20 = vadd.f32 %v148_v19, %v56_v18  ;;  %v449_v21 = vpop.f32.mrb[1].mxu0  ;;  %v400_v18 = vpop.permute.xlu1 %399 }
  0xdc   :  { %v162_v22 = vmul.f32 0.5, %v149_v20  ;;  %v405_v20 = vrot.slane %v400_v18, %v404_v16 }
  0xdd   :  { %v153_v24 = vpop.f32.mrb[2].mxu0 }
  0xde   :  { %489 = vtanh.f32 %v162_v22  ;;  %v154_v25 = vadd.f32 %v153_v24, %v61_v23  ;;  %v452_v26 = vpop.f32.mrb[3].mxu0 }
  0xe0   :  { %v163_v27 = vmul.f32 0.5, %v154_v25 }
  0xe1   :  { %v158_v29 = vpop.f32.mrb[4].mxu0 }
  0xe2   :  { %491 = vtanh.f32 %v163_v27  ;;  %v159_v30 = vadd.f32 %v158_v29, %v66_v28  ;;  %v455_v31 = vpop.f32.mrb[5].mxu0 }
  0xe4   :  { %v164_v32 = vmul.f32 0.5, %v159_v30 }
  0xe6   :  { %493 = vtanh.f32 %v164_v32 }
  0xe8   :  { %v490_v33 = vpop.eup %489 }
  0xe9   :  { %v168_v34 = vmul.f32 0.5, %v490_v33 }
  0xeb   :  { %v171_v37 = vadd.f32 0.5, %v168_v34 }
  0xec   :  { %v492_v35 = vpop.eup %491 }
  0xed   :  { %v169_v36 = vmul.f32 0.5, %v492_v35 }
  0xef   :  { %v172_v38 = vadd.f32 0.5, %v169_v36 }
  0xf0   :  { %v494_v39 = vpop.eup %493 }
  0xf1   :  { %v170_v40 = vmul.f32 0.5, %v494_v39  ;;  %v472_v41 = vpack.c.bf16 %v172_v38, %v171_v37 }
  0xf3   :  { %v173_v42 = vadd.f32 0.5, %v170_v40  ;;  %473 = vmatprep.subr.bf16.mxu1 %v472_v41 }
  0xf4   :  { %475 = vmatpush3.bf16.msra.mxu1 %v472_v41 }
  0xf5   :  { %460 = vmatprep.subr.msk.mxu1 %vm191_vm4, %v173_v42 }
  0xf8   :  { %461 = vmatpush3.msk.msra.mxu1 %vm191_vm4, %v173_v42 }
  0xf9   :  { %463 = vmatmul.mubr.msk.f32.vlgmr.msra.gmra.mrb[0].mxu1 %vm184_vm3, %v42_v43 }
  0xfa   :  { %469 = vmatprep.mubr.msk.f32.mxu1 %vm288_vm5, %v45_v44 }
 0x1cc   :  { %v464_v46 = vpop.f32.mrb[0].mxu1 }
 0x1cd   :  { %v267_v48 = vadd.f32 %v464_v46, %v182_v45  ;;  %v261_v49 = vpop.f32.mrb[1].mxu1 }
 0x1ce   :  { %v262_v50 = vadd.f32 %v261_v49, %v177_v47 }
 0x1cf   :  { %v271_v51 = vmul.f32 0.5, %v267_v48 }
 0x1d0   :  { %v270_v52 = vmul.f32 0.5, %v262_v50 }
 0x1d1   :  { %495 = vtanh.f32 %v271_v51 }
 0x1d2   :  { %497 = vtanh.f32 %v270_v52 }
 0x1db   :  { %v496_v53 = vpop.eup %495 }
 0x1dc   :  { %v498_v54 = vpop.eup %497  ;;  %v275_v55 = vmul.f32 0.5, %v496_v53 }
 0x1dd   :  { %v274_v56 = vmul.f32 0.5, %v498_v54 }
 0x1de   :  { %v277_v57 = vadd.f32 0.5, %v275_v55 }
 0x1df   :  { %v276_v58 = vadd.f32 0.5, %v274_v56 }
 0x1e1   :  { %v476_v59 = vpack.c.bf16 %v277_v57, %v276_v58 }
 0x1e3   :  { %478 = vmatprep.subr.msk.bf16.mxu1 %vm477_vm8, %v476_v59 }
 0x1e4   :  { %481 = vmatpush3.bf16.msk.msra.mxu1 %vm477_vm8, %v476_v59 }
 0x1e7   :  { %470 = vmatmul.mubr.msk.f32.vlgmr.msra.gmra.mrb[2].mxu1 %vm288_vm5, %v46_v60 }
 0x2ba   :  { %v471_v63 = vpop.f32.mrb[2].mxu1 }
 0x2bb   :  { %v371_v0 = vadd.f32 %v471_v63, %v286_v61  ;;  %v365_v1 = vpop.f32.mrb[3].mxu1 }
 0x2bc   :  { %v366_v2 = vadd.f32 %v365_v1, %v281_v62 }
 0x2bd   :  { %v375_v3 = vmax.f32 %v371_v0, 0.0 }
 0x2be   :  { %v374_v5 = vmax.f32 %v366_v2, 0.0 }
 0x2bf   :  { %v387_v7 = vmul.f32 %v384_v4, %v375_v3 }
 0x2c0   :  { %v386_v8 = vmul.f32 %v379_v6, %v374_v5 }
 0x2c1   :  { %v389_v9 = vsel %vm388_vm9, %v387_v7, 0.0 }
 0x2c2   :  { %v390_v11 = vadd.f32 %v389_v9, %v386_v8 }
 0x2c4   :  { %v391_v12 = vrot.slane %v390_v11, 4 }
 0x2c6   :  { %v392_v14 = vadd.f32 %v391_v12, %v390_v11 }
 0x2c8   :  { %v393_v15 = vrot.slane %v392_v14, 2 }
 0x2ca   :  { %v394_v17 = vadd.f32 %v393_v15, %v392_v14 }
 0x2cc   :  { %v395_v19 = vrot.slane %v394_v17, 1 }
 0x2ce   :  { %v396_v21 = vadd.f32 %v395_v19, %v394_v17 }
 0x2d0   :  { %v406_v22 = vadd.f32 %v405_v20, %v396_v21 }
 0x2d2   :  { %407 = vst [vmem:[#allocation3] sm:$0x1] %v406_v22 }
 0x2d3   :  { %510 = shalt.err (!%p507_p4)
}
 0x2d4   :  { %s511_s19 = scalar_lea.hbm %s663_s9, 16 }
 0x2d5   :  { %p512_p5 = scmp.ne.s32.totalorder %s663_s9, %s511_s19  ;;  %p515_p6 = scmp.lt.u32.totalorder %s511_s19, %s663_s9 }
 0x2d7   :  { %p517_p7 = pnand %p515_p6, %p512_p5 }
 0x2d9   :  { %520 = shalt.err (!%p517_p7)
}
 0x2da   :  { %417 = dma.vmem_to_hbm [thread:$0]  %s415_s16, 16, %s663_s9, [#allocation4]  }
 0x2db   :  { %521 = dma.done.wait [#allocation4], 16  }
 0x2dc   :  { %522 = vsyncadd [#allocation4], 4294967280 }
 0x2dd   :  { %421 = vsyncpa [#allocation4], 1 }

</bundles_post_ra>
